<compile_context>
chip_gen: v7x
topology: tpu7x:2x2x1
jax: 0.10.0
libtpu: 0.0.40
codegen_flags: <defaults>
</compile_context>

<pallas_src>
import math

import jax
import jax.numpy as jnp
from jax.experimental import pallas as pl
from jax.experimental.pallas import tpu as pltpu


# ----------------------------- Pallas kernel ------------------------------- #

def _gemm_bias_relu_kernel(w_ref, x_ref, shift_ref, o_ref):
    # (OC, Kp) @ (Kp, Mp) on the MXU (bf16 in, f32 accumulate), then
    # per-channel shift (folded conv bias + BatchNorm) and ReLU in f32.
    acc = jnp.dot(w_ref[...], x_ref[...], preferred_element_type=jnp.float32)
    y = acc + shift_ref[...]                      # (OC, 1) broadcasts over lanes
    o_ref[...] = jnp.maximum(y, 0.0).astype(o_ref.dtype)


def conv_gemm_bias_relu(w, x_km, shift, out_dtype=jnp.bfloat16):
    """w: (OC, Kp) bf16, x_km: (Kp, Mp) bf16 patches, shift: (OC, 1) f32.

    Returns relu(w @ x_km + shift) with shape (OC, Mp), lane-dense in Mp
    (Mp is a multiple of 128).  Single full-block invocation; the whole
    working set is far below scoped VMEM on v5e/v6e/v7x.
    """
    OC, Kp = w.shape
    Kp2, Mp = x_km.shape
    assert Kp == Kp2 and Mp % 128 == 0 and Kp % 128 == 0
    cost = pl.CostEstimate(
        flops=2 * OC * Kp * Mp,
        transcendentals=0,
        bytes_accessed=(w.size * 2 + x_km.size * 2 + shift.size * 4
                        + OC * Mp * 2),
    )
    return pl.pallas_call(
        _gemm_bias_relu_kernel,
        out_shape=jax.ShapeDtypeStruct((OC, Mp), out_dtype),
        grid=(1,),
        in_specs=[
            pl.BlockSpec((OC, Kp), lambda i: (0, 0)),
            pl.BlockSpec((Kp, Mp), lambda i: (0, 0)),
            pl.BlockSpec((OC, 1), lambda i: (0, 0)),
        ],
        out_specs=pl.BlockSpec((OC, Mp), lambda i: (0, 0)),
        compiler_params=pltpu.CompilerParams(
            dimension_semantics=("arbitrary",)),
        cost_estimate=cost,
    )(w, x_km, shift)


# ------------------------------ JAX glue code ------------------------------ #

def _round_up(n, m):
    return ((n + m - 1) // m) * m


def im2col_cm(x, k, stride, k_pad_to=None, m_align=None, dtype=jnp.bfloat16):
    """Channel-major im2col with fused K/M zero-padding.

    x: (C, B, H, W) -> patches (Kp, Mp) where K = C*k*k, M = B*OH*OW.
    Row order (c, kh, kw) matches PyTorch conv weight.reshape(OC, C*k*k);
    column order (b, oh, ow) matches the (OC, M) GEMM output of the previous
    layer.  K is padded up to `k_pad_to`, M up to a multiple of `m_align`;
    the pad + dtype cast fuse with the im2col under jit.
    Returns (patches, OH, OW, M_unpadded).
    """
    C, B, H, W = x.shape
    OH = (H - k) // stride + 1
    OW = (W - k) // stride + 1
    taps = []
    for di in range(k):
        for dj in range(k):
            taps.append(x[:, :, di:di + stride * OH:stride,
                          dj:dj + stride * OW:stride])
    p = jnp.stack(taps, axis=1)                    # (C, k*k, B, OH, OW)
    K, M = C * k * k, B * OH * OW
    p = p.reshape(K, M)
    Kp = k_pad_to if k_pad_to is not None else K
    Mp = _round_up(M, m_align) if m_align is not None else M
    if (Kp, Mp) != (K, M):
        p = jnp.pad(p, ((0, Kp - K), (0, Mp - M)))
    return p.astype(dtype), OH, OW, M


def _conv_bn_params(key, ic, oc, k=5, eps=1e-5, pad_k=True,
                    w_dtype=jnp.bfloat16):
    """Deterministic Conv2d(ic, oc, k, stride=2) + eval-mode BatchNorm(oc),
    folded into a GEMM weight (OC, Kp) and a per-channel f32 shift."""
    kw_, kb_, kg_, kbt_ = jax.random.split(key, 4)
    fan_in = ic * k * k
    bound = 1.0 / math.sqrt(fan_in)
    w = jax.random.uniform(kw_, (oc, ic, k, k), jnp.float32, -bound, bound)
    b = jax.random.uniform(kb_, (oc,), jnp.float32, -bound, bound)
    gamma = 1.0 + 0.05 * jax.random.normal(kg_, (oc,), jnp.float32)
    beta = 0.05 * jax.random.normal(kbt_, (oc,), jnp.float32)
    running_mean = jnp.zeros((oc,), jnp.float32)
    running_var = jnp.ones((oc,), jnp.float32)

    scale = gamma / jnp.sqrt(running_var + eps)               # (OC,)
    shift = (b - running_mean) * scale + beta                 # (OC,)

    K = ic * k * k
    w_gemm = w.reshape(oc, K) * scale[:, None]                # fold BN scale
    if pad_k:
        Kp = _round_up(K, 128)
        w_gemm = jnp.pad(w_gemm, ((0, 0), (0, Kp - K)))       # K -> 128-aligned
    return w_gemm.astype(w_dtype), shift.reshape(oc, 1)


def init_params(key):
    k1, k2, k3, k4, k5 = jax.random.split(key, 5)
    params = {
        # Pallas layers: bf16 weights, 128-aligned K.
        "l1": _conv_bn_params(k1, 3, 16),
        "l2": _conv_bn_params(k2, 16, 32),
        # XLA layer: keep f32, no K pad needed.
        "l3": _conv_bn_params(k3, 32, 32, pad_k=False, w_dtype=jnp.float32),
    }
    bound = 1.0 / math.sqrt(448)
    head_w = jax.random.uniform(k4, (2, 448), jnp.float32, -bound, bound)
    head_b = jax.random.uniform(k5, (2,), jnp.float32, -bound, bound)
    params["head_w"] = jnp.transpose(head_w)                  # (448, 2)
    params["head_b"] = head_b
    return params


def dqn_forward(x_nchw, params):
    B = x_nchw.shape[0]
    # NCHW -> channel-major (C, B, H, W), cast once to bf16 for the MXU path.
    x = jnp.transpose(x_nchw, (1, 0, 2, 3)).astype(jnp.bfloat16)

    # Layers 1 & 2: Pallas lane-dense full-block GEMM kernels.
    for name in ("l1", "l2"):
        w, shift = params[name]
        patches, OH, OW, M = im2col_cm(x, k=5, stride=2,
                                       k_pad_to=w.shape[1], m_align=128)
        y = conv_gemm_bias_relu(w, patches, shift)            # (OC, Mp)
        # Padded M columns hold relu(shift) garbage -> slice before reuse.
        x = y[:, :M].reshape(w.shape[0], B, OH, OW)           # (OC, B, OH, OW)

    # Layer 3 (M = B*2*7, ~1.6 MFLOP) + flatten + head: plain XLA, fused by jit.
    w3, shift3 = params["l3"]
    patches3, OH3, OW3, _ = im2col_cm(x, k=5, stride=2, dtype=jnp.float32)
    y3 = jnp.maximum(w3 @ patches3 + shift3, 0.0)             # (32, B*OH3*OW3)
    y3 = y3.reshape(32, B, OH3, OW3)
    # PyTorch x.view(B, -1) flattens per batch in (C, H, W) order.
    flat = jnp.transpose(y3, (1, 0, 2, 3)).reshape(B, 32 * OH3 * OW3)
    return flat @ params["head_w"] + params["head_b"]         # (B, 2)


if __name__ == "__main__":
    key = jax.random.PRNGKey(0)
    k_params, k_x = jax.random.split(key)
    params = init_params(k_params)
    # (B, 3, 38, 78): smallest "screen" giving the hardcoded 448-dim head input
    # (conv trunk -> (32, 2, 7) -> 448).
    x = jax.random.normal(k_x, (2, 3, 38, 78), jnp.float32)

    forward = jax.jit(dqn_forward)
    out = jax.block_until_ready(forward(x, params))
    assert out.shape == (2, 2), out.shape
    assert bool(jnp.all(jnp.isfinite(out)))
    print("KERNEL_OK")
</pallas_src>

<mosaic_0001>
module attributes {stable_mosaic.version = 11 : i64} {
  func.func @_gemm_bias_relu_kernel(%arg0: i32, %arg1: memref<16x128xbf16, #tpu.memory_space<vmem>>, %arg2: memref<128x1280xbf16, #tpu.memory_space<vmem>>, %arg3: memref<16x1xf32, #tpu.memory_space<vmem>>, %arg4: memref<16x1280xbf16, #tpu.memory_space<vmem>>) attributes {dimension_semantics = [#tpu.dimension_semantics<arbitrary>], iteration_bounds = array<i64: 1>, scalar_prefetch = 0 : i64, scratch_operands = 0 : i64, tpu.core_type = #tpu.core_type<tc>, window_params = [{pipeline_mode = #tpu.pipeline_mode<synchronous>, transform_indices = @transform_0, window_bounds = array<i64: 16, 128>}, {pipeline_mode = #tpu.pipeline_mode<synchronous>, transform_indices = @transform_1, window_bounds = array<i64: 128, 1280>}, {pipeline_mode = #tpu.pipeline_mode<synchronous>, transform_indices = @transform_2, window_bounds = array<i64: 16, 1>}, {pipeline_mode = #tpu.pipeline_mode<synchronous>, transform_indices = @transform_3, window_bounds = array<i64: 16, 1280>}]} {
    %c0 = arith.constant 0 : index
    %c0_0 = arith.constant 0 : index
    %0 = vector.load %arg1[%c0, %c0_0] : memref<16x128xbf16, #tpu.memory_space<vmem>>, vector<16x128xbf16>
    %c0_1 = arith.constant 0 : index
    %c0_2 = arith.constant 0 : index
    %1 = vector.load %arg2[%c0_1, %c0_2] : memref<128x1280xbf16, #tpu.memory_space<vmem>>, vector<128x1280xbf16>
    %cst = arith.constant dense<0.000000e+00> : vector<16x1280xf32>
    %2 = tpu.matmul %0, %1, %cst {dimension_numbers = #tpu.dot_dimension_numbers<[1], [0], [0], [1], [0, 0, 1, 1], [], []>} : vector<16x128xbf16>, vector<128x1280xbf16>, vector<16x1280xf32> -> vector<16x1280xf32>
    %c0_3 = arith.constant 0 : index
    %c0_4 = arith.constant 0 : index
    %3 = vector.load %arg3[%c0_3, %c0_4] : memref<16x1xf32, #tpu.memory_space<vmem>>, vector<16x1xf32>
    %4 = vector.broadcast %3 : vector<16x1xf32> to vector<16x1280xf32>
    %5 = arith.addf %2, %4 : vector<16x1280xf32>
    %cst_5 = arith.constant 0.000000e+00 : f32
    %6 = vector.broadcast %cst_5 : f32 to vector<16x1280xf32>
    %7 = arith.maximumf %5, %6 : vector<16x1280xf32>
    %8 = arith.truncf %7 : vector<16x1280xf32> to vector<16x1280xbf16>
    %c0_6 = arith.constant 0 : index
    %c0_7 = arith.constant 0 : index
    %9 = vector.load %arg4[%c0_6, %c0_7] : memref<16x1280xbf16, #tpu.memory_space<vmem>>, vector<16x1280xbf16>
    tpu.vector_store %arg4[%c0_6, %c0_7], %8 {strides = array<i32>} : memref<16x1280xbf16, #tpu.memory_space<vmem>>, vector<16x1280xbf16>,
    return
  }
  func.func @transform_0(%arg0: i32) -> (i32, i32) {
    %c0_i32 = arith.constant 0 : i32
    %c0_i32_0 = arith.constant 0 : i32
    %c0_i32_1 = arith.constant 0 : i32
    return %c0_i32, %c0_i32_0 : i32, i32
  }
  func.func @transform_1(%arg0: i32) -> (i32, i32) {
    %c0_i32 = arith.constant 0 : i32
    %c0_i32_0 = arith.constant 0 : i32
    %c0_i32_1 = arith.constant 0 : i32
    return %c0_i32, %c0_i32_0 : i32, i32
  }
  func.func @transform_2(%arg0: i32) -> (i32, i32) {
    %c0_i32 = arith.constant 0 : i32
    %c0_i32_0 = arith.constant 0 : i32
    %c0_i32_1 = arith.constant 0 : i32
    return %c0_i32, %c0_i32_0 : i32, i32
  }
  func.func @transform_3(%arg0: i32) -> (i32, i32) {
    %c0_i32 = arith.constant 0 : i32
    %c0_i32_0 = arith.constant 0 : i32
    %c0_i32_1 = arith.constant 0 : i32
    return %c0_i32, %c0_i32_0 : i32, i32
  }
}

module attributes {stable_mosaic.version = 11 : i64} {
  func.func @_gemm_bias_relu_kernel(%arg0: i32, %arg1: memref<32x512xbf16, #tpu.memory_space<vmem>>, %arg2: memref<512x256xbf16, #tpu.memory_space<vmem>>, %arg3: memref<32x1xf32, #tpu.memory_space<vmem>>, %arg4: memref<32x256xbf16, #tpu.memory_space<vmem>>) attributes {dimension_semantics = [#tpu.dimension_semantics<arbitrary>], iteration_bounds = array<i64: 1>, scalar_prefetch = 0 : i64, scratch_operands = 0 : i64, tpu.core_type = #tpu.core_type<tc>, window_params = [{pipeline_mode = #tpu.pipeline_mode<synchronous>, transform_indices = @transform_0, window_bounds = array<i64: 32, 512>}, {pipeline_mode = #tpu.pipeline_mode<synchronous>, transform_indices = @transform_1, window_bounds = array<i64: 512, 256>}, {pipeline_mode = #tpu.pipeline_mode<synchronous>, transform_indices = @transform_2, window_bounds = array<i64: 32, 1>}, {pipeline_mode = #tpu.pipeline_mode<synchronous>, transform_indices = @transform_3, window_bounds = array<i64: 32, 256>}]} {
    %c0 = arith.constant 0 : index
    %c0_0 = arith.constant 0 : index
    %0 = vector.load %arg1[%c0, %c0_0] : memref<32x512xbf16, #tpu.memory_space<vmem>>, vector<32x512xbf16>
    %c0_1 = arith.constant 0 : index
    %c0_2 = arith.constant 0 : index
    %1 = vector.load %arg2[%c0_1, %c0_2] : memref<512x256xbf16, #tpu.memory_space<vmem>>, vector<512x256xbf16>
    %cst = arith.constant dense<0.000000e+00> : vector<32x256xf32>
    %2 = tpu.matmul %0, %1, %cst {dimension_numbers = #tpu.dot_dimension_numbers<[1], [0], [0], [1], [0, 0, 1, 1], [], []>} : vector<32x512xbf16>, vector<512x256xbf16>, vector<32x256xf32> -> vector<32x256xf32>
    %c0_3 = arith.constant 0 : index
    %c0_4 = arith.constant 0 : index
    %3 = vector.load %arg3[%c0_3, %c0_4] : memref<32x1xf32, #tpu.memory_space<vmem>>, vector<32x1xf32>
    %4 = vector.broadcast %3 : vector<32x1xf32> to vector<32x256xf32>
    %5 = arith.addf %2, %4 : vector<32x256xf32>
    %cst_5 = arith.constant 0.000000e+00 : f32
    %6 = vector.broadcast %cst_5 : f32 to vector<32x256xf32>
    %7 = arith.maximumf %5, %6 : vector<32x256xf32>
    %8 = arith.truncf %7 : vector<32x256xf32> to vector<32x256xbf16>
    %c0_6 = arith.constant 0 : index
    %c0_7 = arith.constant 0 : index
    %9 = vector.load %arg4[%c0_6, %c0_7] : memref<32x256xbf16, #tpu.memory_space<vmem>>, vector<32x256xbf16>
    tpu.vector_store %arg4[%c0_6, %c0_7], %8 {strides = array<i32>} : memref<32x256xbf16, #tpu.memory_space<vmem>>, vector<32x256xbf16>,
    return
  }
  func.func @transform_0(%arg0: i32) -> (i32, i32) {
    %c0_i32 = arith.constant 0 : i32
    %c0_i32_0 = arith.constant 0 : i32
    %c0_i32_1 = arith.constant 0 : i32
    return %c0_i32, %c0_i32_0 : i32, i32
  }
  func.func @transform_1(%arg0: i32) -> (i32, i32) {
    %c0_i32 = arith.constant 0 : i32
    %c0_i32_0 = arith.constant 0 : i32
    %c0_i32_1 = arith.constant 0 : i32
    return %c0_i32, %c0_i32_0 : i32, i32
  }
  func.func @transform_2(%arg0: i32) -> (i32, i32) {
    %c0_i32 = arith.constant 0 : i32
    %c0_i32_0 = arith.constant 0 : i32
    %c0_i32_1 = arith.constant 0 : i32
    return %c0_i32, %c0_i32_0 : i32, i32
  }
  func.func @transform_3(%arg0: i32) -> (i32, i32) {
    %c0_i32 = arith.constant 0 : i32
    %c0_i32_0 = arith.constant 0 : i32
    %c0_i32_1 = arith.constant 0 : i32
    return %c0_i32, %c0_i32_0 : i32, i32
  }
}

</mosaic_0001>

<bundles_post_ra>
// kernel: dqn_forward.2
= control target key start
LH: loop header
LB: loop body
LE: loop exit
PB: predicated region body
PF: predicated region fallthrough
CT: control target
= control target key end

     0   :  { %v1048_v1 = vmov 0   ;;  %s1385_s1 = inlined_call_operand.vmem [shape: bf16[128,1280], index: 1, kind: input, shape index: {}]   ;;  %s1386_s0 = inlined_call_operand.vmem [shape: bf16[16,128], index: 0, kind: input, shape index: {}]   ;;  %s1387_s2 = inlined_call_operand.vmem [shape: f32[16,1], index: 2, kind: input, shape index: {}]   ;;  %s1388_s3 = inlined_call_operand.vmem [shape: bf16[16,1280], index: 3, kind: output, shape index: {}]  }
   0x1   :  { %v927_v0 = vld [vmem:[%s1385_s1 + $0x4] ss:$40 sps:$4 sm:$0xff]   ;;  %547 = vmatprep.mubr.bf16.mxu0 %v1048_v1  ;;  %590 = vmatprep.mubr.bf16.mxu1 %v1048_v1  ;;  %v929_v2 = vld [vmem:[%s1385_s1] ss:$40 sps:$4 sm:$0xff]   ;;  %v930_v3 = vld [vmem:[%s1385_s1 + $0x54] ss:$40 sps:$4 sm:$0xff]  }
   0x2   :  { %926 = vset.pattern.permute.xlu0 %v1048_v1  ;;  %515 = vmatprep.subr.bf16.mxu0 %v927_v0  ;;  %v932_v4 = vld [vmem:[%s1385_s1 + $0x50] ss:$40 sps:$4 sm:$0xff]   ;;  %v933_v5 = vld [vmem:[%s1385_s1 + $0xa4] ss:$40 sps:$4 sm:$0xff]   ;;  %v935_v6 = vld [vmem:[%s1385_s1 + $0xa0] ss:$40 sps:$4 sm:$0xff]  }
   0x3   :  { %516 = vmatpush1.bf16.msra.mxu0 %v929_v2  ;;  %v936_v7 = vld [vmem:[%s1385_s1 + $0xf4] ss:$40 sps:$4 sm:$0xff]   ;;  %v938_v8 = vld [vmem:[%s1385_s1 + $0xf0] ss:$40 sps:$4 sm:$0xff]   ;;  %v939_v11 = vld [vmem:[%s1385_s1 + $0x144] ss:$40 sps:$4 sm:$0xff]  }
   0x4   :  { %517 = vmatprep.subr.bf16.mxu0 %v930_v3  ;;  %v950_v9 = vld [vmem:[%s1385_s1 + $0xc] ss:$40 sps:$4 sm:$0xff]   ;;  %v953_v10 = vld [vmem:[%s1385_s1 + $0x8] ss:$40 sps:$4 sm:$0xff]   ;;  %v955_v12 = vld [vmem:[%s1385_s1 + $0x5c] ss:$40 sps:$4 sm:$0xff]  }
   0x5   :  { %558 = vmatprep.subr.bf16.mxu1 %v950_v9  ;;  %v941_v13 = vld [vmem:[%s1385_s1 + $0x140] ss:$40 sps:$4 sm:$0xff]   ;;  %v942_v14 = vld [vmem:[%s1385_s1 + $0x194] ss:$40 sps:$4 sm:$0xff]   ;;  %v944_v17 = vld [vmem:[%s1385_s1 + $0x190] ss:$40 sps:$4 sm:$0xff]  }
   0x6   :  { %559 = vmatpush1.bf16.msra.mxu1 %v953_v10  ;;  %v960_v15 = vld [vmem:[%s1385_s1 + $0x58] ss:$40 sps:$4 sm:$0xff]   ;;  %v961_v16 = vld [vmem:[%s1385_s1 + $0xac] ss:$40 sps:$4 sm:$0xff]   ;;  %v966_v18 = vld [vmem:[%s1385_s1 + $0xa8] ss:$40 sps:$4 sm:$0xff]  }
   0x7   :  { %518 = vmatpush1.bf16.msra.mxu0 %v932_v4  ;;  %560 = vmatprep.subr.bf16.mxu1 %v955_v12  ;;  %v967_v19 = vld [vmem:[%s1385_s1 + $0xfc] ss:$40 sps:$4 sm:$0xff]   ;;  %v972_v21 = vld [vmem:[%s1385_s1 + $0xf8] ss:$40 sps:$4 sm:$0xff]   ;;  %v973_v23 = vld [vmem:[%s1385_s1 + $0x14c] ss:$40 sps:$4 sm:$0xff]  }
   0x8   :  { %519 = vmatprep.subr.bf16.mxu0 %v933_v5  ;;  %v945_v20 = vld [vmem:[%s1385_s1 + $0x1e4] ss:$40 sps:$4 sm:$0xff]   ;;  %v947_v22 = vld [vmem:[%s1385_s1 + $0x1e0] ss:$40 sps:$4 sm:$0xff]   ;;  %v948_v24 = vld [vmem:[%s1385_s1 + $0x234] ss:$40 sps:$4 sm:$0xff]  }
   0x9   :  { %v952_v25 = vld [vmem:[%s1385_s1 + $0x230] ss:$40 sps:$4 sm:$0xff]   ;;  %v979_v27 = vld [vmem:[%s1385_s1 + $0x19c] ss:$40 sps:$4 sm:$0xff]   ;;  %v985_v32 = vld [vmem:[%s1385_s1 + $0x1ec] ss:$40 sps:$4 sm:$0xff]  }
   0xa   :  { %561 = vmatpush1.bf16.msra.mxu1 %v960_v15  ;;  %v978_v26 = vld [vmem:[%s1385_s1 + $0x148] ss:$40 sps:$4 sm:$0xff]   ;;  %v959_v28 = vld [vmem:[%s1385_s1 + $0x14] ss:$40 sps:$4 sm:$0xff]   ;;  %v1159_v29 = vld [vmem:[%s1386_s0] sm:$0xff]  }
   0xb   :  { %520 = vmatpush1.bf16.msra.mxu0 %v935_v6  ;;  %562 = vmatprep.subr.bf16.mxu1 %v961_v16  ;;  %v984_v30 = vld [vmem:[%s1385_s1 + $0x198] ss:$40 sps:$4 sm:$0xff]   ;;  %v965_v33 = vld [vmem:[%s1385_s1 + $0x64] ss:$40 sps:$4 sm:$0xff]   ;;  %v990_v34 = vld [vmem:[%s1385_s1 + $0x1e8] ss:$40 sps:$4 sm:$0xff]  }
   0xc   :  { %521 = vmatprep.subr.bf16.mxu0 %v936_v7  ;;  %v957_v31 = vld [vmem:[%s1385_s1 + $0x10] ss:$40 sps:$4 sm:$0xff]   ;;  %v963_v35 = vld [vmem:[%s1385_s1 + $0x60] ss:$40 sps:$4 sm:$0xff]   ;;  %v991_v36 = vld [vmem:[%s1385_s1 + $0x23c] ss:$40 sps:$4 sm:$0xff]  }
   0xd   :  { %v971_v37 = vld [vmem:[%s1385_s1 + $0xb4] ss:$40 sps:$4 sm:$0xff]   ;;  %v996_v38 = vld [vmem:[%s1385_s1 + $0x238] ss:$40 sps:$4 sm:$0xff]   ;;  %v977_v41 = vld [vmem:[%s1385_s1 + $0x104] ss:$40 sps:$4 sm:$0xff]  }
   0xe   :  { %563 = vmatpush1.bf16.msra.mxu1 %v966_v18  ;;  %v969_v39 = vld [vmem:[%s1385_s1 + $0xb0] ss:$40 sps:$4 sm:$0xff]   ;;  %v1002_v40 = vld [vmem:[%s1385_s1 + $0x1c] ss:$40 sps:$4 sm:$0xff]   ;;  %v975_v43 = vld [vmem:[%s1385_s1 + $0x100] ss:$40 sps:$4 sm:$0xff]  }
   0xf   :  { %522 = vmatpush1.bf16.msra.mxu0 %v938_v8  ;;  %564 = vmatprep.subr.bf16.mxu1 %v967_v19  ;;  %v1000_v42 = vld [vmem:[%s1385_s1 + $0x18] ss:$40 sps:$4 sm:$0xff]   ;;  %v1005_v44 = vld [vmem:[%s1385_s1 + $0x6c] ss:$40 sps:$4 sm:$0xff]   ;;  %v1003_v46 = vld [vmem:[%s1385_s1 + $0x68] ss:$40 sps:$4 sm:$0xff]  }
  0x10   :  { %523 = vmatprep.subr.bf16.mxu0 %v939_v11  ;;  %v983_v45 = vld [vmem:[%s1385_s1 + $0x154] ss:$40 sps:$4 sm:$0xff]   ;;  %v981_v47 = vld [vmem:[%s1385_s1 + $0x150] ss:$40 sps:$4 sm:$0xff]   ;;  %v989_v49 = vld [vmem:[%s1385_s1 + $0x1a4] ss:$40 sps:$4 sm:$0xff]  }
  0x11   :  { %v1011_v48 = vld [vmem:[%s1385_s1 + $0xbc] ss:$40 sps:$4 sm:$0xff]   ;;  %v1009_v50 = vld [vmem:[%s1385_s1 + $0xb8] ss:$40 sps:$4 sm:$0xff]   ;;  %v1017_v52 = vld [vmem:[%s1385_s1 + $0x10c] ss:$40 sps:$4 sm:$0xff]  }
  0x12   :  { %565 = vmatpush1.bf16.msra.mxu1 %v972_v21  ;;  %v987_v51 = vld [vmem:[%s1385_s1 + $0x1a0] ss:$40 sps:$4 sm:$0xff]   ;;  %v995_v53 = vld [vmem:[%s1385_s1 + $0x1f4] ss:$40 sps:$4 sm:$0xff]   ;;  %v993_v56 = vld [vmem:[%s1385_s1 + $0x1f0] ss:$40 sps:$4 sm:$0xff]  }
  0x13   :  { %524 = vmatpush1.bf16.msra.mxu0 %v941_v13  ;;  %566 = vmatprep.subr.bf16.mxu1 %v973_v23  ;;  %v1015_v54 = vld [vmem:[%s1385_s1 + $0x108] ss:$40 sps:$4 sm:$0xff]   ;;  %v97_v55 = vld [vmem:[%s1387_s2] sm:$0xff]  ;;  %v1029_v62 = vld [vmem:[%s1385_s1 + $0x1ac] ss:$40 sps:$4 sm:$0xff]  }
  0x14   :  { %525 = vmatprep.subr.bf16.mxu0 %v942_v14  ;;  %v1023_v57 = vld [vmem:[%s1385_s1 + $0x15c] ss:$40 sps:$4 sm:$0xff]   ;;  %101 = vperm.xlu0 %926, %v97_v55   ;;  %v98_v59 = vld [vmem:[%s1387_s2 + $0x8] sm:$0xff]  ;;  %v1021_v60 = vld [vmem:[%s1385_s1 + $0x158] ss:$40 sps:$4 sm:$0xff]  }
  0x15   :  { %v999_v58 = vld [vmem:[%s1385_s1 + $0x244] ss:$40 sps:$4 sm:$0xff]   ;;  %v997_v61 = vld [vmem:[%s1385_s1 + $0x240] ss:$40 sps:$4 sm:$0xff]   ;;  %v1014_v4 = vld [vmem:[%s1385_s1 + $0x74] ss:$40 sps:$4 sm:$0xff]  }
  0x16   :  { %567 = vmatpush1.bf16.msra.mxu1 %v978_v26  ;;  %v1008_v63 = vld [vmem:[%s1385_s1 + $0x24] ss:$40 sps:$4 sm:$0xff]   ;;  %v1027_v0 = vld [vmem:[%s1385_s1 + $0x1a8] ss:$40 sps:$4 sm:$0xff]   ;;  %v1033_v5 = vld [vmem:[%s1385_s1 + $0x1f8] ss:$40 sps:$4 sm:$0xff]  }
  0x17   :  { %526 = vmatpush1.bf16.msra.mxu0 %v944_v17  ;;  %568 = vmatprep.subr.bf16.mxu1 %v979_v27  ;;  %v1006_v2 = vld [vmem:[%s1385_s1 + $0x20] ss:$40 sps:$4 sm:$0xff]   ;;  %v1035_v3 = vld [vmem:[%s1385_s1 + $0x1fc] ss:$40 sps:$4 sm:$0xff]   ;;  %v1012_v6 = vld [vmem:[%s1385_s1 + $0x70] ss:$40 sps:$4 sm:$0xff]  }
  0x18   :  { %527 = vmatprep.subr.bf16.mxu0 %v945_v20  ;;  %106 = vperm.xlu0 %926, %v98_v59   ;;  %v1041_v7 = vld [vmem:[%s1385_s1 + $0x24c] ss:$40 sps:$4 sm:$0xff]   ;;  %v1039_v9 = vld [vmem:[%s1385_s1 + $0x248] ss:$40 sps:$4 sm:$0xff]  }
  0x19   :  { %v1020_v8 = vld [vmem:[%s1385_s1 + $0xc4] ss:$40 sps:$4 sm:$0xff]   ;;  %v1018_v10 = vld [vmem:[%s1385_s1 + $0xc0] ss:$40 sps:$4 sm:$0xff]   ;;  %v1026_v11 = vld [vmem:[%s1385_s1 + $0x114] ss:$40 sps:$4 sm:$0xff]  }
  0x1a   :  { %569 = vmatpush1.bf16.msra.mxu1 %v984_v30  ;;  %v1032_v12 = vld [vmem:[%s1385_s1 + $0x164] ss:$40 sps:$4 sm:$0xff]   ;;  %v1030_v13 = vld [vmem:[%s1385_s1 + $0x160] ss:$40 sps:$4 sm:$0xff]   ;;  %v1038_v14 = vld [vmem:[%s1385_s1 + $0x1b4] ss:$40 sps:$4 sm:$0xff]  }
  0x1b   :  { %528 = vmatpush1.bf16.msra.mxu0 %v947_v22  ;;  %570 = vmatprep.subr.bf16.mxu1 %v985_v32  ;;  %v1036_v15 = vld [vmem:[%s1385_s1 + $0x1b0] ss:$40 sps:$4 sm:$0xff]   ;;  %v1044_v16 = vld [vmem:[%s1385_s1 + $0x204] ss:$40 sps:$4 sm:$0xff]   ;;  %v1042_v17 = vld [vmem:[%s1385_s1 + $0x200] ss:$40 sps:$4 sm:$0xff]  }
  0x1c   :  { %529 = vmatprep.subr.bf16.mxu0 %v948_v24  ;;  %v1047_v18 = vld [vmem:[%s1385_s1 + $0x254] ss:$40 sps:$4 sm:$0xff]   ;;  %v1045_v19 = vld [vmem:[%s1385_s1 + $0x250] ss:$40 sps:$4 sm:$0xff]  }
  0x1e   :  { %571 = vmatpush1.bf16.msra.mxu1 %v990_v34 }
  0x1f   :  { %530 = vmatpush1.bf16.msra.mxu0 %v952_v25  ;;  %572 = vmatprep.subr.bf16.mxu1 %v991_v36 }
  0x20   :  { %601 = vmatprep.subr.bf16.mxu0 %v959_v28 }
  0x22   :  { %548 = vmatmul.mubr.bf16.vlgmr.msra.gmra.mrb[0].mxu0 %v1159_v29  ;;  %573 = vmatpush1.bf16.msra.mxu1 %v996_v38 }
  0x23   :  { %602 = vmatpush1.bf16.msra.mxu0 %v957_v31  ;;  %633 = vmatprep.mubr.bf16.mxu0 %v1048_v1 }
  0x24   :  { %603 = vmatprep.subr.bf16.mxu0 %v965_v33  ;;  %644 = vmatprep.subr.bf16.mxu1 %v1002_v40 }
  0x25   :  { %591 = vmatmul.mubr.bf16.vlgmr.msra.gmra.mrb[0].mxu1 %v1159_v29 }
  0x26   :  { %645 = vmatpush1.bf16.msra.mxu1 %v1000_v42  ;;  %676 = vmatprep.mubr.bf16.mxu1 %v1048_v1 }
  0x27   :  { %604 = vmatpush1.bf16.msra.mxu0 %v963_v35  ;;  %646 = vmatprep.subr.bf16.mxu1 %v1005_v44 }
  0x28   :  { %605 = vmatprep.subr.bf16.mxu0 %v971_v37 }
  0x2a   :  { %647 = vmatpush1.bf16.msra.mxu1 %v1003_v46 }
  0x2b   :  { %606 = vmatpush1.bf16.msra.mxu0 %v969_v39  ;;  %648 = vmatprep.subr.bf16.mxu1 %v1011_v48 }
  0x2c   :  { %607 = vmatprep.subr.bf16.mxu0 %v977_v41 }
  0x2e   :  { %649 = vmatpush1.bf16.msra.mxu1 %v1009_v50 }
  0x2f   :  { %608 = vmatpush1.bf16.msra.mxu0 %v975_v43  ;;  %650 = vmatprep.subr.bf16.mxu1 %v1017_v52 }
  0x30   :  { %609 = vmatprep.subr.bf16.mxu0 %v983_v45 }
  0x32   :  { %651 = vmatpush1.bf16.msra.mxu1 %v1015_v54 }
  0x33   :  { %610 = vmatpush1.bf16.msra.mxu0 %v981_v47  ;;  %652 = vmatprep.subr.bf16.mxu1 %v1023_v57 }
  0x34   :  { %611 = vmatprep.subr.bf16.mxu0 %v989_v49 }
  0x36   :  { %653 = vmatpush1.bf16.msra.mxu1 %v1021_v60 }
  0x37   :  { %612 = vmatpush1.bf16.msra.mxu0 %v987_v51  ;;  %654 = vmatprep.subr.bf16.mxu1 %v1029_v62 }
  0x38   :  { %613 = vmatprep.subr.bf16.mxu0 %v995_v53 }
  0x3a   :  { %655 = vmatpush1.bf16.msra.mxu1 %v1027_v0 }
  0x3b   :  { %614 = vmatpush1.bf16.msra.mxu0 %v993_v56  ;;  %656 = vmatprep.subr.bf16.mxu1 %v1035_v3 }
  0x3c   :  { %615 = vmatprep.subr.bf16.mxu0 %v999_v58 }
  0x3e   :  { %657 = vmatpush1.bf16.msra.mxu1 %v1033_v5 }
  0x3f   :  { %616 = vmatpush1.bf16.msra.mxu0 %v997_v61  ;;  %658 = vmatprep.subr.bf16.mxu1 %v1041_v7 }
  0x40   :  { %687 = vmatprep.subr.bf16.mxu0 %v1008_v63 }
  0x42   :  { %634 = vmatmul.mubr.bf16.vlgmr.msra.gmra.mrb[4].mxu0 %v1159_v29  ;;  %659 = vmatpush1.bf16.msra.mxu1 %v1039_v9 }
  0x43   :  { %688 = vmatpush1.bf16.msra.mxu0 %v1006_v2  ;;  %719 = vmatprep.mubr.bf16.mxu0 %v1048_v1  ;;  %v1024_v1 = vld [vmem:[%s1385_s1 + $0x110] ss:$40 sps:$4 sm:$0xff]  }
  0x44   :  { %689 = vmatprep.subr.bf16.mxu0 %v1014_v4 }
  0x45   :  { %677 = vmatmul.mubr.bf16.vlgmr.msra.gmra.mrb[4].mxu1 %v1159_v29 }
  0x47   :  { %690 = vmatpush1.bf16.msra.mxu0 %v1012_v6 }
  0x48   :  { %691 = vmatprep.subr.bf16.mxu0 %v1020_v8 }
  0x4b   :  { %692 = vmatpush1.bf16.msra.mxu0 %v1018_v10 }
  0x4c   :  { %693 = vmatprep.subr.bf16.mxu0 %v1026_v11 }
  0x4f   :  { %694 = vmatpush1.bf16.msra.mxu0 %v1024_v1 }
  0x50   :  { %695 = vmatprep.subr.bf16.mxu0 %v1032_v12 }
  0x53   :  { %696 = vmatpush1.bf16.msra.mxu0 %v1030_v13 }
  0x54   :  { %697 = vmatprep.subr.bf16.mxu0 %v1038_v14 }
  0x57   :  { %698 = vmatpush1.bf16.msra.mxu0 %v1036_v15 }
  0x58   :  { %699 = vmatprep.subr.bf16.mxu0 %v1044_v16 }
  0x5b   :  { %700 = vmatpush1.bf16.msra.mxu0 %v1042_v17 }
  0x5c   :  { %701 = vmatprep.subr.bf16.mxu0 %v1047_v18 }
  0x5f   :  { %702 = vmatpush1.bf16.msra.mxu0 %v1045_v19 }
  0x62   :  { %720 = vmatmul.mubr.bf16.vlgmr.msra.gmra.mrb[8].mxu0 %v1159_v29 }
  0x93   :  { %v1331_v20 = vpop.permute.xlu0 %101 }
  0x97   :  { %v1333_v22 = vpop.permute.xlu0 %106 }
  0xf5   :  { %v549_v21 = vpop.f32.mrb[0].mxu0 }
  0xf6   :  { %v550_v23 = vadd.f32 %v549_v21, %v1331_v20  ;;  %v551_v24 = vpop.f32.mrb[1].mxu0 }
  0xf7   :  { %v552_v25 = vadd.f32 %v551_v24, %v1331_v20  ;;  %v553_v26 = vpop.f32.mrb[2].mxu0 }
  0xf8   :  { %v730_v27 = vmax.f32 %v550_v23, 0.0  ;;  %v554_v28 = vadd.f32 %v553_v26, %v1333_v22  ;;  %v555_v30 = vpop.f32.mrb[3].mxu0  ;;  %v592_v36 = vpop.f32.mrb[0].mxu1 }
  0xf9   :  { %v731_v31 = vmax.f32 %v552_v25, 0.0  ;;  %v556_v32 = vadd.f32 %v555_v30, %v1333_v22  ;;  %v593_v37 = vadd.f32 %v592_v36, %v1331_v20  ;;  %v594_v38 = vpop.f32.mrb[1].mxu1 }
  0xfa   :  { %v740_v33 = vmax.f32 %v554_v28, 0.0  ;;  %v595_v39 = vadd.f32 %v594_v38, %v1331_v20  ;;  %v596_v40 = vpop.f32.mrb[2].mxu1 }
  0xfb   :  { %v915_v29 = vpack.c.bf16 %v731_v31, %v730_v27  ;;  %v741_v34 = vmax.f32 %v556_v32, 0.0  ;;  %v732_v41 = vmax.f32 %v593_v37, 0.0  ;;  %v597_v42 = vadd.f32 %v596_v40, %v1333_v22  ;;  %v598_v43 = vpop.f32.mrb[3].mxu1 }
  0xfc   :  { %v733_v44 = vmax.f32 %v595_v39, 0.0  ;;  %v599_v45 = vadd.f32 %v598_v43, %v1333_v22 }
  0xfd   :  { %810 = vst [vmem:[%s1388_s3] sm:$0xff] %v915_v29  ;;  %v920_v35 = vpack.c.bf16 %v741_v34, %v740_v33  ;;  %v742_v46 = vmax.f32 %v597_v42, 0.0 }
  0xfe   :  { %v916_v47 = vpack.c.bf16 %v733_v44, %v732_v41  ;;  %v743_v48 = vmax.f32 %v599_v45, 0.0 }
  0xff   :  { %815 = vst [vmem:[%s1388_s3 + $0x28] sm:$0xff] %v920_v35 }
 0x100   :  { %811 = vst [vmem:[%s1388_s3 + $0x8] sm:$0xff] %v916_v47  ;;  %v921_v49 = vpack.c.bf16 %v743_v48, %v742_v46 }
 0x102   :  { %816 = vst [vmem:[%s1388_s3 + $0x30] sm:$0xff] %v921_v49 }
 0x115   :  { %v635_v50 = vpop.f32.mrb[4].mxu0 }
 0x116   :  { %v636_v51 = vadd.f32 %v635_v50, %v1331_v20  ;;  %v637_v52 = vpop.f32.mrb[5].mxu0 }
 0x117   :  { %v638_v53 = vadd.f32 %v637_v52, %v1331_v20  ;;  %v639_v54 = vpop.f32.mrb[6].mxu0 }
 0x118   :  { %v734_v55 = vmax.f32 %v636_v51, 0.0  ;;  %v640_v56 = vadd.f32 %v639_v54, %v1333_v22  ;;  %v641_v57 = vpop.f32.mrb[7].mxu0  ;;  %v678_v0 = vpop.f32.mrb[4].mxu1 }
 0x119   :  { %v735_v58 = vmax.f32 %v638_v53, 0.0  ;;  %v642_v59 = vadd.f32 %v641_v57, %v1333_v22  ;;  %v679_v2 = vadd.f32 %v678_v0, %v1331_v20  ;;  %v680_v3 = vpop.f32.mrb[5].mxu1 }
 0x11a   :  { %v744_v60 = vmax.f32 %v640_v56, 0.0  ;;  %v681_v4 = vadd.f32 %v680_v3, %v1331_v20  ;;  %v682_v5 = vpop.f32.mrb[6].mxu1 }
 0x11b   :  { %v917_v61 = vpack.c.bf16 %v735_v58, %v734_v55  ;;  %v745_v62 = vmax.f32 %v642_v59, 0.0  ;;  %v736_v6 = vmax.f32 %v679_v2, 0.0  ;;  %v683_v7 = vadd.f32 %v682_v5, %v1333_v22  ;;  %v684_v8 = vpop.f32.mrb[7].mxu1 }
 0x11c   :  { %v737_v9 = vmax.f32 %v681_v4, 0.0  ;;  %v685_v10 = vadd.f32 %v684_v8, %v1333_v22 }
 0x11d   :  { %812 = vst [vmem:[%s1388_s3 + $0x10] sm:$0xff] %v917_v61  ;;  %v922_v63 = vpack.c.bf16 %v745_v62, %v744_v60  ;;  %v746_v11 = vmax.f32 %v683_v7, 0.0 }
 0x11e   :  { %v918_v1 = vpack.c.bf16 %v737_v9, %v736_v6  ;;  %v747_v12 = vmax.f32 %v685_v10, 0.0 }
 0x11f   :  { %817 = vst [vmem:[%s1388_s3 + $0x38] sm:$0xff] %v922_v63 }
 0x120   :  { %813 = vst [vmem:[%s1388_s3 + $0x18] sm:$0xff] %v918_v1  ;;  %v923_v13 = vpack.c.bf16 %v747_v12, %v746_v11 }
 0x122   :  { %818 = vst [vmem:[%s1388_s3 + $0x40] sm:$0xff] %v923_v13 }
 0x135   :  { %v721_v14 = vpop.f32.mrb[8].mxu0 }
 0x136   :  { %v722_v15 = vadd.f32 %v721_v14, %v1331_v20  ;;  %v723_v16 = vpop.f32.mrb[9].mxu0 }
 0x137   :  { %v724_v17 = vadd.f32 %v723_v16, %v1331_v20  ;;  %v725_v18 = vpop.f32.mrb[10].mxu0 }
 0x138   :  { %v738_v19 = vmax.f32 %v722_v15, 0.0  ;;  %v726_v21 = vadd.f32 %v725_v18, %v1333_v22  ;;  %v727_v23 = vpop.f32.mrb[11].mxu0 }
 0x139   :  { %v739_v24 = vmax.f32 %v724_v17, 0.0  ;;  %v728_v25 = vadd.f32 %v727_v23, %v1333_v22 }
 0x13a   :  { %v748_v26 = vmax.f32 %v726_v21, 0.0 }
 0x13b   :  { %v919_v27 = vpack.c.bf16 %v739_v24, %v738_v19  ;;  %v749_v28 = vmax.f32 %v728_v25, 0.0 }
 0x13d   :  { %814 = vst [vmem:[%s1388_s3 + $0x20] sm:$0xff] %v919_v27  ;;  %v924_v30 = vpack.c.bf16 %v749_v28, %v748_v26 }
 0x13f   :  { %819 = vst [vmem:[%s1388_s3 + $0x48] sm:$0xff] %v924_v30 }

// kernel: dqn_forward.3
= control target key start
LH: loop header
LB: loop body
LE: loop exit
PB: predicated region body
PF: predicated region fallthrough
CT: control target
= control target key end

     0   :  { %v823_v1 = vmov 0   ;;  %s1084_s1 = inlined_call_operand.vmem [shape: bf16[512,256], index: 1, kind: input, shape index: {}]   ;;  %s1085_s0 = inlined_call_operand.vmem [shape: bf16[32,512], index: 0, kind: input, shape index: {}]   ;;  %s1086_s2 = inlined_call_operand.vmem [shape: f32[32,1], index: 2, kind: input, shape index: {}]   ;;  %s1087_s3 = inlined_call_operand.vmem [shape: bf16[32,256], index: 3, kind: output, shape index: {}]  }
   0x1   :  { %v715_v0 = vld [vmem:[%s1084_s1 + $0x4] ss:$8 sps:$4 sm:$0xff]   ;;  %713 = vset.pattern.permute.xlu0 %v823_v1  ;;  %714 = vset.pattern.permute.xlu1 %v823_v1  ;;  %v719_v3 = vld [vmem:[%s1084_s1] ss:$8 sps:$4 sm:$0xff]   ;;  %v721_v5 = vld [vmem:[%s1084_s1 + $0x14] ss:$8 sps:$4 sm:$0xff]  }
   0x2   :  { %v717_v2 = vld [vmem:[%s1084_s1 + $0x104] ss:$8 sps:$4 sm:$0xff]   ;;  %470 = vmatprep.subr.bf16.mxu1 %v715_v0  ;;  %v720_v4 = vld [vmem:[%s1084_s1 + $0x100] ss:$8 sps:$4 sm:$0xff]   ;;  %v723_v6 = vld [vmem:[%s1084_s1 + $0x114] ss:$8 sps:$4 sm:$0xff]  }
   0x3   :  { %523 = vmatprep.subr.bf16.mxu0 %v717_v2  ;;  %471 = vmatpush1.bf16.msra.mxu1 %v719_v3  ;;  %v725_v7 = vld [vmem:[%s1084_s1 + $0x10] ss:$8 sps:$4 sm:$0xff]   ;;  %v727_v9 = vld [vmem:[%s1084_s1 + $0x24] ss:$8 sps:$4 sm:$0xff]   ;;  %v731_v11 = vld [vmem:[%s1084_s1 + $0x20] ss:$8 sps:$4 sm:$0xff]  }
   0x4   :  { %524 = vmatpush1.bf16.msra.mxu0 %v720_v4  ;;  %472 = vmatprep.subr.bf16.mxu1 %v721_v5  ;;  %v726_v8 = vld [vmem:[%s1084_s1 + $0x110] ss:$8 sps:$4 sm:$0xff]   ;;  %v729_v10 = vld [vmem:[%s1084_s1 + $0x124] ss:$8 sps:$4 sm:$0xff]   ;;  %v732_v12 = vld [vmem:[%s1084_s1 + $0x120] ss:$8 sps:$4 sm:$0xff]  }
   0x5   :  { %525 = vmatprep.subr.bf16.mxu0 %v723_v6  ;;  %v733_v13 = vld [vmem:[%s1084_s1 + $0x34] ss:$8 sps:$4 sm:$0xff]   ;;  %v737_v15 = vld [vmem:[%s1084_s1 + $0x30] ss:$8 sps:$4 sm:$0xff]   ;;  %v739_v17 = vld [vmem:[%s1084_s1 + $0x44] ss:$8 sps:$4 sm:$0xff]  }
   0x6   :  { %v735_v14 = vld [vmem:[%s1084_s1 + $0x134] ss:$8 sps:$4 sm:$0xff]   ;;  %v738_v16 = vld [vmem:[%s1084_s1 + $0x130] ss:$8 sps:$4 sm:$0xff]   ;;  %v741_v18 = vld [vmem:[%s1084_s1 + $0x144] ss:$8 sps:$4 sm:$0xff]  }
   0x7   :  { %473 = vmatpush1.bf16.msra.mxu1 %v725_v7  ;;  %v743_v19 = vld [vmem:[%s1084_s1 + $0x40] ss:$8 sps:$4 sm:$0xff]   ;;  %v745_v21 = vld [vmem:[%s1084_s1 + $0x54] ss:$8 sps:$4 sm:$0xff]   ;;  %v749_v23 = vld [vmem:[%s1084_s1 + $0x50] ss:$8 sps:$4 sm:$0xff]  }
   0x8   :  { %526 = vmatpush1.bf16.msra.mxu0 %v726_v8  ;;  %474 = vmatprep.subr.bf16.mxu1 %v727_v9  ;;  %v744_v20 = vld [vmem:[%s1084_s1 + $0x140] ss:$8 sps:$4 sm:$0xff]   ;;  %v747_v22 = vld [vmem:[%s1084_s1 + $0x154] ss:$8 sps:$4 sm:$0xff]   ;;  %v750_v24 = vld [vmem:[%s1084_s1 + $0x150] ss:$8 sps:$4 sm:$0xff]  }
   0x9   :  { %527 = vmatprep.subr.bf16.mxu0 %v729_v10  ;;  %v751_v25 = vld [vmem:[%s1084_s1 + $0x64] ss:$8 sps:$4 sm:$0xff]   ;;  %v755_v27 = vld [vmem:[%s1084_s1 + $0x60] ss:$8 sps:$4 sm:$0xff]   ;;  %v757_v29 = vld [vmem:[%s1084_s1 + $0x74] ss:$8 sps:$4 sm:$0xff]  }
   0xa   :  { %v753_v26 = vld [vmem:[%s1084_s1 + $0x164] ss:$8 sps:$4 sm:$0xff]   ;;  %v756_v28 = vld [vmem:[%s1084_s1 + $0x160] ss:$8 sps:$4 sm:$0xff]   ;;  %v759_v30 = vld [vmem:[%s1084_s1 + $0x174] ss:$8 sps:$4 sm:$0xff]  }
   0xb   :  { %475 = vmatpush1.bf16.msra.mxu1 %v731_v11  ;;  %v761_v31 = vld [vmem:[%s1084_s1 + $0x70] ss:$8 sps:$4 sm:$0xff]   ;;  %v763_v33 = vld [vmem:[%s1084_s1 + $0x84] ss:$8 sps:$4 sm:$0xff]   ;;  %v767_v35 = vld [vmem:[%s1084_s1 + $0x80] ss:$8 sps:$4 sm:$0xff]  }
   0xc   :  { %528 = vmatpush1.bf16.msra.mxu0 %v732_v12  ;;  %476 = vmatprep.subr.bf16.mxu1 %v733_v13  ;;  %v762_v32 = vld [vmem:[%s1084_s1 + $0x170] ss:$8 sps:$4 sm:$0xff]   ;;  %v765_v34 = vld [vmem:[%s1084_s1 + $0x184] ss:$8 sps:$4 sm:$0xff]   ;;  %v768_v36 = vld [vmem:[%s1084_s1 + $0x180] ss:$8 sps:$4 sm:$0xff]  }
   0xd   :  { %529 = vmatprep.subr.bf16.mxu0 %v735_v14  ;;  %v769_v37 = vld [vmem:[%s1084_s1 + $0x94] ss:$8 sps:$4 sm:$0xff]   ;;  %v773_v39 = vld [vmem:[%s1084_s1 + $0x90] ss:$8 sps:$4 sm:$0xff]   ;;  %v775_v41 = vld [vmem:[%s1084_s1 + $0xa4] ss:$8 sps:$4 sm:$0xff]  }
   0xe   :  { %v771_v38 = vld [vmem:[%s1084_s1 + $0x194] ss:$8 sps:$4 sm:$0xff]   ;;  %v774_v40 = vld [vmem:[%s1084_s1 + $0x190] ss:$8 sps:$4 sm:$0xff]   ;;  %v777_v42 = vld [vmem:[%s1084_s1 + $0x1a4] ss:$8 sps:$4 sm:$0xff]  }
   0xf   :  { %477 = vmatpush1.bf16.msra.mxu1 %v737_v15  ;;  %v779_v43 = vld [vmem:[%s1084_s1 + $0xa0] ss:$8 sps:$4 sm:$0xff]   ;;  %v781_v45 = vld [vmem:[%s1084_s1 + $0xb4] ss:$8 sps:$4 sm:$0xff]   ;;  %v785_v47 = vld [vmem:[%s1084_s1 + $0xb0] ss:$8 sps:$4 sm:$0xff]  }
  0x10   :  { %530 = vmatpush1.bf16.msra.mxu0 %v738_v16  ;;  %478 = vmatprep.subr.bf16.mxu1 %v739_v17  ;;  %v780_v44 = vld [vmem:[%s1084_s1 + $0x1a0] ss:$8 sps:$4 sm:$0xff]   ;;  %v783_v46 = vld [vmem:[%s1084_s1 + $0x1b4] ss:$8 sps:$4 sm:$0xff]   ;;  %v786_v48 = vld [vmem:[%s1084_s1 + $0x1b0] ss:$8 sps:$4 sm:$0xff]  }
  0x11   :  { %531 = vmatprep.subr.bf16.mxu0 %v741_v18  ;;  %v787_v49 = vld [vmem:[%s1084_s1 + $0xc4] ss:$8 sps:$4 sm:$0xff]   ;;  %v791_v53 = vld [vmem:[%s1084_s1 + $0xc0] ss:$8 sps:$4 sm:$0xff]   ;;  %v88_v56 = vld [vmem:[%s1086_s2 + $0x10] sm:$0xff] }
  0x12   :  { %v813_v50 = vld [vmem:[%s1085_s0 + $0x4] ss:$16 sps:$4 sm:$0xff]   ;;  %v816_v52 = vld [vmem:[%s1085_s0 + $0xc] ss:$16 sps:$4 sm:$0xff]   ;;  %v792_v54 = vld [vmem:[%s1084_s1 + $0x1c0] ss:$8 sps:$4 sm:$0xff]   ;;  %102 = vperm.xlu1 %714, %v88_v56  }
  0x13   :  { %479 = vmatpush1.bf16.msra.mxu1 %v743_v19  ;;  %v789_v51 = vld [vmem:[%s1084_s1 + $0x1c4] ss:$8 sps:$4 sm:$0xff]   ;;  %502 = vmatprep.mubr.bf16.mxu1 %v813_v50  ;;  %v793_v57 = vld [vmem:[%s1084_s1 + $0xd4] ss:$8 sps:$4 sm:$0xff]   ;;  %v797_v61 = vld [vmem:[%s1084_s1 + $0xd0] ss:$8 sps:$4 sm:$0xff]  }
  0x14   :  { %532 = vmatpush1.bf16.msra.mxu0 %v744_v20  ;;  %480 = vmatprep.subr.bf16.mxu1 %v745_v21  ;;  %v86_v55 = vld [vmem:[%s1086_s2] sm:$0xff]  ;;  %v795_v58 = vld [vmem:[%s1084_s1 + $0x1d4] ss:$8 sps:$4 sm:$0xff]   ;;  %v87_v59 = vld [vmem:[%s1086_s2 + $0x8] sm:$0xff] }
  0x15   :  { %533 = vmatprep.subr.bf16.mxu0 %v747_v22  ;;  %555 = vmatprep.mubr.bf16.mxu0 %v816_v52  ;;  %v89_v60 = vld [vmem:[%s1086_s2 + $0x18] sm:$0xff]  ;;  %v799_v63 = vld [vmem:[%s1084_s1 + $0xe4] ss:$8 sps:$4 sm:$0xff]   ;;  %v803_v1 = vld [vmem:[%s1084_s1 + $0xe0] ss:$8 sps:$4 sm:$0xff]  }
  0x16   :  { %92 = vperm.xlu0 %713, %v86_v55   ;;  %v798_v62 = vld [vmem:[%s1084_s1 + $0x1d0] ss:$8 sps:$4 sm:$0xff]   ;;  %v801_v0 = vld [vmem:[%s1084_s1 + $0x1e4] ss:$8 sps:$4 sm:$0xff]   ;;  %107 = vperm.xlu1 %714, %v89_v60   ;;  %v804_v2 = vld [vmem:[%s1084_s1 + $0x1e0] ss:$8 sps:$4 sm:$0xff]  }
  0x17   :  { %481 = vmatpush1.bf16.msra.mxu1 %v749_v23  ;;  %v805_v3 = vld [vmem:[%s1084_s1 + $0xf4] ss:$8 sps:$4 sm:$0xff]   ;;  %v809_v5 = vld [vmem:[%s1084_s1 + $0xf0] ss:$8 sps:$4 sm:$0xff]  }
  0x18   :  { %534 = vmatpush1.bf16.msra.mxu0 %v750_v24  ;;  %482 = vmatprep.subr.bf16.mxu1 %v751_v25  ;;  %v807_v4 = vld [vmem:[%s1084_s1 + $0x1f4] ss:$8 sps:$4 sm:$0xff]   ;;  %v810_v6 = vld [vmem:[%s1084_s1 + $0x1f0] ss:$8 sps:$4 sm:$0xff]  }
  0x19   :  { %535 = vmatprep.subr.bf16.mxu0 %v753_v26  ;;  %v811_v7 = vld [vmem:[%s1085_s0] ss:$16 sps:$4 sm:$0xff]   ;;  %v814_v8 = vld [vmem:[%s1085_s0 + $0x8] ss:$16 sps:$4 sm:$0xff]   ;;  %v817_v9 = vld [vmem:[%s1085_s0 + $0x24] ss:$16 sps:$4 sm:$0xff]  }
  0x1a   :  { %97 = vperm.xlu0 %713, %v87_v59   ;;  %v819_v10 = vld [vmem:[%s1085_s0 + $0x2c] ss:$16 sps:$4 sm:$0xff]   ;;  %v821_v11 = vld [vmem:[%s1085_s0 + $0x20] ss:$16 sps:$4 sm:$0xff]   ;;  %v822_v12 = vld [vmem:[%s1085_s0 + $0x28] ss:$16 sps:$4 sm:$0xff]  }
  0x1b   :  { %483 = vmatpush1.bf16.msra.mxu1 %v755_v27 }
  0x1c   :  { %536 = vmatpush1.bf16.msra.mxu0 %v756_v28  ;;  %484 = vmatprep.subr.bf16.mxu1 %v757_v29 }
  0x1d   :  { %537 = vmatprep.subr.bf16.mxu0 %v759_v30 }
  0x1f   :  { %485 = vmatpush1.bf16.msra.mxu1 %v761_v31 }
  0x20   :  { %538 = vmatpush1.bf16.msra.mxu0 %v762_v32  ;;  %486 = vmatprep.subr.bf16.mxu1 %v763_v33 }
  0x21   :  { %539 = vmatprep.subr.bf16.mxu0 %v765_v34 }
  0x23   :  { %487 = vmatpush1.bf16.msra.mxu1 %v767_v35 }
  0x24   :  { %540 = vmatpush1.bf16.msra.mxu0 %v768_v36  ;;  %488 = vmatprep.subr.bf16.mxu1 %v769_v37 }
  0x25   :  { %541 = vmatprep.subr.bf16.mxu0 %v771_v38 }
  0x27   :  { %489 = vmatpush1.bf16.msra.mxu1 %v773_v39 }
  0x28   :  { %542 = vmatpush1.bf16.msra.mxu0 %v774_v40  ;;  %490 = vmatprep.subr.bf16.mxu1 %v775_v41 }
  0x29   :  { %543 = vmatprep.subr.bf16.mxu0 %v777_v42 }
  0x2b   :  { %491 = vmatpush1.bf16.msra.mxu1 %v779_v43 }
  0x2c   :  { %544 = vmatpush1.bf16.msra.mxu0 %v780_v44  ;;  %492 = vmatprep.subr.bf16.mxu1 %v781_v45 }
  0x2d   :  { %545 = vmatprep.subr.bf16.mxu0 %v783_v46 }
  0x2f   :  { %493 = vmatpush1.bf16.msra.mxu1 %v785_v47 }
  0x30   :  { %546 = vmatpush1.bf16.msra.mxu0 %v786_v48  ;;  %494 = vmatprep.subr.bf16.mxu1 %v787_v49 }
  0x31   :  { %547 = vmatprep.subr.bf16.mxu0 %v789_v51 }
  0x33   :  { %495 = vmatpush1.bf16.msra.mxu1 %v791_v53 }
  0x34   :  { %548 = vmatpush1.bf16.msra.mxu0 %v792_v54  ;;  %496 = vmatprep.subr.bf16.mxu1 %v793_v57 }
  0x35   :  { %549 = vmatprep.subr.bf16.mxu0 %v795_v58 }
  0x37   :  { %497 = vmatpush1.bf16.msra.mxu1 %v797_v61 }
  0x38   :  { %550 = vmatpush1.bf16.msra.mxu0 %v798_v62  ;;  %498 = vmatprep.subr.bf16.mxu1 %v799_v63 }
  0x39   :  { %551 = vmatprep.subr.bf16.mxu0 %v801_v0 }
  0x3b   :  { %499 = vmatpush1.bf16.msra.mxu1 %v803_v1 }
  0x3c   :  { %552 = vmatpush1.bf16.msra.mxu0 %v804_v2  ;;  %500 = vmatprep.subr.bf16.mxu1 %v805_v3 }
  0x3d   :  { %553 = vmatprep.subr.bf16.mxu0 %v807_v4 }
  0x3f   :  { %501 = vmatpush1.bf16.msra.mxu1 %v809_v5 }
  0x40   :  { %554 = vmatpush1.bf16.msra.mxu0 %v810_v6 }
  0x42   :  { %503 = vmatmul.mubr.bf16.vlgmr.msra.gmra.mrb[0].mxu1 %v811_v7 }
  0x43   :  { %556 = vmatmul.mubr.bf16.vlgmr.msra.gmra.mrb[0].mxu0 %v814_v8  ;;  %512 = vmatprep.mubr.bf16.mxu1 %v817_v9 }
  0x44   :  { %565 = vmatprep.mubr.bf16.mxu0 %v819_v10 }
  0x4a   :  { %513 = vmatmul.mubr.bf16.gmra.mrb[4].mxu1 %v821_v11 }
  0x4b   :  { %566 = vmatmul.mubr.bf16.gmra.mrb[4].mxu0 %v822_v12 }
  0x91   :  { %v103_v15 = vpop.permute.xlu1 %102 }
  0x95   :  { %v93_v13 = vpop.permute.xlu0 %92  ;;  %v108_v35 = vpop.permute.xlu1 %107 }
  0x99   :  { %v98_v14 = vpop.permute.xlu0 %97 }
 0x115   :  { %v504_v16 = vpop.f32.mrb[0].mxu1 }
 0x116   :  { %v557_v17 = vpop.f32.mrb[0].mxu0  ;;  %v505_v18 = vadd.f32 %v504_v16, %v93_v13  ;;  %v506_v19 = vpop.f32.mrb[1].mxu1 }
 0x117   :  { %v559_v20 = vpop.f32.mrb[1].mxu0  ;;  %v507_v21 = vadd.f32 %v506_v19, %v93_v13  ;;  %v508_v22 = vpop.f32.mrb[2].mxu1 }
 0x118   :  { %v561_v23 = vpop.f32.mrb[2].mxu0  ;;  %v558_v24 = vadd.f32 %v557_v17, %v505_v18  ;;  %v509_v25 = vadd.f32 %v508_v22, %v98_v14  ;;  %v510_v26 = vpop.f32.mrb[3].mxu1 }
 0x119   :  { %v563_v27 = vpop.f32.mrb[3].mxu0  ;;  %v560_v28 = vadd.f32 %v559_v20, %v507_v21  ;;  %v511_v29 = vadd.f32 %v510_v26, %v98_v14 }
 0x11a   :  { %v576_v30 = vmax.f32 %v558_v24, 0.0  ;;  %v562_v31 = vadd.f32 %v561_v23, %v509_v25 }
 0x11b   :  { %v577_v32 = vmax.f32 %v560_v28, 0.0  ;;  %v564_v33 = vadd.f32 %v563_v27, %v511_v29 }
 0x11c   :  { %v578_v34 = vmax.f32 %v562_v31, 0.0 }
 0x11d   :  { %v692_v36 = vpack.c.bf16 %v577_v32, %v576_v30  ;;  %v579_v37 = vmax.f32 %v564_v33, 0.0  ;;  %v514_v38 = vpop.f32.mrb[4].mxu1 }
 0x11e   :  { %v567_v39 = vpop.f32.mrb[4].mxu0  ;;  %v515_v40 = vadd.f32 %v514_v38, %v103_v15  ;;  %v516_v41 = vpop.f32.mrb[5].mxu1 }
 0x11f   :  { %v569_v42 = vpop.f32.mrb[5].mxu0  ;;  %608 = vst [vmem:[%s1087_s3] sm:$0xff] %v692_v36  ;;  %v693_v43 = vpack.c.bf16 %v579_v37, %v578_v34  ;;  %v517_v44 = vadd.f32 %v516_v41, %v103_v15  ;;  %v518_v45 = vpop.f32.mrb[6].mxu1 }
 0x120   :  { %v571_v46 = vpop.f32.mrb[6].mxu0  ;;  %v568_v47 = vadd.f32 %v567_v39, %v515_v40  ;;  %v519_v48 = vadd.f32 %v518_v45, %v108_v35  ;;  %v520_v49 = vpop.f32.mrb[7].mxu1 }
 0x121   :  { %v573_v50 = vpop.f32.mrb[7].mxu0  ;;  %609 = vst [vmem:[%s1087_s3 + $0x8] sm:$0xff] %v693_v43  ;;  %v570_v51 = vadd.f32 %v569_v42, %v517_v44  ;;  %v521_v52 = vadd.f32 %v520_v49, %v108_v35 }
 0x122   :  { %v580_v53 = vmax.f32 %v568_v47, 0.0  ;;  %v572_v54 = vadd.f32 %v571_v46, %v519_v48 }
 0x123   :  { %v581_v55 = vmax.f32 %v570_v51, 0.0  ;;  %v574_v56 = vadd.f32 %v573_v50, %v521_v52 }
 0x124   :  { %v582_v57 = vmax.f32 %v572_v54, 0.0 }
 0x125   :  { %v694_v58 = vpack.c.bf16 %v581_v55, %v580_v53  ;;  %v583_v59 = vmax.f32 %v574_v56, 0.0 }
 0x127   :  { %610 = vst [vmem:[%s1087_s3 + $0x10] sm:$0xff] %v694_v58  ;;  %v695_v60 = vpack.c.bf16 %v583_v59, %v582_v57 }
 0x129   :  { %611 = vst [vmem:[%s1087_s3 + $0x18] sm:$0xff] %v695_v60 }

</bundles_post_ra>
